<compile_context>
chip_gen: v5e
topology: v5e:2x2
jax: 0.10.0
libtpu: 0.0.40
codegen_flags: <defaults>
</compile_context>

<pallas_src>
import functools

import jax
import jax.numpy as jnp
from jax.experimental import pallas as pl
from jax.experimental.pallas import tpu as pltpu

H = 128        # lane stride used to keep each packed weight 128-lane aligned
HIDDEN = 64    # logical hidden size of the PyTorch module
TB_CAP = 1024  # max batch-tile rows per grid step


def _round_up(x, m):
    return (x + m - 1) // m * m


def qnetwork_kernel(x_ref, w_ref, b_ref, out_ref, *, hidden):
    x = x_ref[...]                          # (TB, S)  — unpadded feature lanes
    S = x_ref.shape[-1]
    A = out_ref.shape[-1]

    # Static, aligned slices of the packed (rows, 3*128) weight slab (no copies:
    # each weight starts at a 128-lane boundary; row slices are 8-multiples for
    # the LunarLander sizes).
    w1 = w_ref[0:S, 0:hidden]               # (S, 64)
    w2 = w_ref[0:hidden, H:H + hidden]      # (64, 64)
    w3 = w_ref[0:hidden, 2 * H:2 * H + A]   # (64, A)

    b1 = b_ref[0:1, 0:hidden]               # (1, 64)
    b2 = b_ref[1:2, 0:hidden]               # (1, 64)
    b3 = b_ref[2:3, 0:A]                    # (1, A)

    # fc1 + relu
    h1 = jnp.dot(x, w1, preferred_element_type=jnp.float32) + b1
    h1 = jnp.maximum(h1, 0.0)
    # fc2 + relu
    h2 = jnp.dot(h1, w2, preferred_element_type=jnp.float32) + b2
    h2 = jnp.maximum(h2, 0.0)
    # fc3 (Q-values, no activation) -> narrow (TB, A) output block
    q = jnp.dot(h2, w3, preferred_element_type=jnp.float32) + b3
    out_ref[...] = q.astype(out_ref.dtype)


def pack_params(params, state_size, action_size, hidden=HIDDEN):
    """Concatenate all weights into one (rows, 3*128) slab and all biases into
    one (8, 128) slab so only 2 small param DMAs stay VMEM-resident."""
    rows = max(_round_up(state_size, 8), hidden)
    w = jnp.zeros((rows, 3 * H), jnp.float32)
    w = w.at[:state_size, 0:hidden].set(params["w1"])
    w = w.at[:hidden, H:H + hidden].set(params["w2"])
    w = w.at[:hidden, 2 * H:2 * H + action_size].set(params["w3"])

    b = jnp.zeros((8, H), jnp.float32)
    b = b.at[0, :hidden].set(params["b1"].reshape(-1))
    b = b.at[1, :hidden].set(params["b2"].reshape(-1))
    b = b.at[2, :action_size].set(params["b3"].reshape(-1))
    return w, b


def qnetwork_forward(state, params):
    """state: (B, state_size) float32. params: dict of w1,b1,w2,b2,w3,b3."""
    B, S = state.shape
    action_size = params["w3"].shape[1]
    hidden = params["w1"].shape[1]

    # Tile the batch: at most TB_CAP rows per grid step, tile size derived from
    # the actual B so padding stays <= 8 rows per step.  Batches > TB_CAP get
    # >= 2 grid steps, letting the "parallel" axis span both v7x TensorCores.
    n_steps = max(1, -(-B // TB_CAP))
    TB = _round_up(max(1, -(-B // n_steps)), 8)
    B_pad = n_steps * TB

    x = state.astype(jnp.float32)
    if B_pad != B:
        # Pad only along batch (S lanes wide) — tiny vs. the old 128-lane slab.
        x = jnp.zeros((B_pad, S), jnp.float32).at[:B, :].set(x)

    w_pack, b_pack = pack_params(params, S, action_size, hidden)

    out = pl.pallas_call(
        functools.partial(qnetwork_kernel, hidden=hidden),
        out_shape=jax.ShapeDtypeStruct((B_pad, action_size), jnp.float32),
        grid=(n_steps,),
        in_specs=[
            pl.BlockSpec((TB, S), lambda i: (i, 0)),            # state tile, pipelined
            pl.BlockSpec(w_pack.shape, lambda i: (0, 0)),       # packed weights, resident
            pl.BlockSpec(b_pack.shape, lambda i: (0, 0)),       # packed biases, resident
        ],
        out_specs=pl.BlockSpec((TB, action_size), lambda i: (i, 0)),  # narrow output
        compiler_params=pltpu.CompilerParams(
            dimension_semantics=("parallel",)),
    )(x, w_pack, b_pack)

    return out[:B]


def init_params(key, state_size, action_size, hidden=HIDDEN):
    """Deterministic init mimicking nn.Linear's uniform(-1/sqrt(fan_in), 1/sqrt(fan_in)).
    Weights stored transposed vs. PyTorch as (in_features, out_features)."""
    ks = jax.random.split(key, 6)

    def linear(kw, kb, fan_in, fan_out):
        bound = 1.0 / jnp.sqrt(jnp.float32(fan_in))
        w = jax.random.uniform(kw, (fan_in, fan_out), jnp.float32, -bound, bound)
        b = jax.random.uniform(kb, (1, fan_out), jnp.float32, -bound, bound)
        return w, b

    w1, b1 = linear(ks[0], ks[1], state_size, hidden)
    w2, b2 = linear(ks[2], ks[3], hidden, hidden)
    w3, b3 = linear(ks[4], ks[5], hidden, action_size)
    return {"w1": w1, "b1": b1, "w2": w2, "b2": b2, "w3": w3, "b3": b3}


def qnetwork_ref(state, p):
    h1 = jnp.maximum(state @ p["w1"] + p["b1"], 0.0)
    h2 = jnp.maximum(h1 @ p["w2"] + p["b2"], 0.0)
    return h2 @ p["w3"] + p["b3"]


if __name__ == "__main__":
    # LunarLander-v2: state_size=8, action_size=4.
    state_size, action_size = 8, 4

    key = jax.random.PRNGKey(0)
    k_params, k_small, k_big = jax.random.split(key, 3)
    params = init_params(k_params, state_size, action_size)

    # Small inference-style batch.
    state_small = jax.random.normal(k_small, (2, state_size), jnp.float32)
    q_small = qnetwork_forward(state_small, params)
    jax.block_until_ready(q_small)
    assert q_small.shape == (2, action_size)
    assert jnp.allclose(q_small, qnetwork_ref(state_small, params), atol=1e-5, rtol=1e-5)

    # Replay-buffer-style, non-multiple-of-8 batch to exercise batch padding.
    state_big = jax.random.normal(k_big, (600, state_size), jnp.float32)
    q_big = qnetwork_forward(state_big, params)
    jax.block_until_ready(q_big)
    assert q_big.shape == (600, action_size)
    assert jnp.allclose(q_big, qnetwork_ref(state_big, params), atol=1e-5, rtol=1e-5)

    print("KERNEL_OK")
</pallas_src>

<mosaic_0001>
module attributes {stable_mosaic.version = 11 : i64} {
  func.func @qnetwork_kernel(%arg0: i32, %arg1: memref<8x8xf32, #tpu.memory_space<vmem>>, %arg2: memref<64x384xf32, #tpu.memory_space<vmem>>, %arg3: memref<8x128xf32, #tpu.memory_space<vmem>>, %arg4: memref<8x4xf32, #tpu.memory_space<vmem>>) attributes {dimension_semantics = [#tpu.dimension_semantics<parallel>], iteration_bounds = array<i64: 1>, scalar_prefetch = 0 : i64, scratch_operands = 0 : i64, tpu.core_type = #tpu.core_type<tc>, window_params = [{transform_indices = @transform_0, window_bounds = array<i64: 8, 8>}, {pipeline_mode = #tpu.pipeline_mode<synchronous>, transform_indices = @transform_1, window_bounds = array<i64: 64, 384>}, {pipeline_mode = #tpu.pipeline_mode<synchronous>, transform_indices = @transform_2, window_bounds = array<i64: 8, 128>}, {transform_indices = @transform_3, window_bounds = array<i64: 8, 4>}]} {
    %c0 = arith.constant 0 : index
    %c0_0 = arith.constant 0 : index
    %0 = vector.load %arg1[%c0, %c0_0] : memref<8x8xf32, #tpu.memory_space<vmem>>, vector<8x8xf32>
    %c0_1 = arith.constant 0 : index
    %c0_2 = arith.constant 0 : index
    %1 = vector.load %arg2[%c0_1, %c0_2] : memref<64x384xf32, #tpu.memory_space<vmem>>, vector<8x64xf32>
    %c0_3 = arith.constant 0 : index
    %c128 = arith.constant 128 : index
    %2 = vector.load %arg2[%c0_3, %c128] : memref<64x384xf32, #tpu.memory_space<vmem>>, vector<64x64xf32>
    %c0_4 = arith.constant 0 : index
    %c256 = arith.constant 256 : index
    %3 = vector.load %arg2[%c0_4, %c256] : memref<64x384xf32, #tpu.memory_space<vmem>>, vector<64x4xf32>
    %c0_5 = arith.constant 0 : index
    %c0_6 = arith.constant 0 : index
    %4 = vector.load %arg3[%c0_5, %c0_6] : memref<8x128xf32, #tpu.memory_space<vmem>>, vector<1x64xf32>
    %c1 = arith.constant 1 : index
    %c0_7 = arith.constant 0 : index
    %5 = vector.load %arg3[%c1, %c0_7] : memref<8x128xf32, #tpu.memory_space<vmem>>, vector<1x64xf32>
    %c2 = arith.constant 2 : index
    %c0_8 = arith.constant 0 : index
    %6 = vector.load %arg3[%c2, %c0_8] : memref<8x128xf32, #tpu.memory_space<vmem>>, vector<1x4xf32>
    %cst = arith.constant dense<0.000000e+00> : vector<8x64xf32>
    %7 = tpu.matmul %0, %1, %cst {dimension_numbers = #tpu.dot_dimension_numbers<[1], [0], [0], [1], [0, 0, 1, 1], [], []>} : vector<8x8xf32>, vector<8x64xf32>, vector<8x64xf32> -> vector<8x64xf32>
    %8 = vector.broadcast %4 : vector<1x64xf32> to vector<8x64xf32>
    %9 = arith.addf %7, %8 : vector<8x64xf32>
    %cst_9 = arith.constant 0.000000e+00 : f32
    %10 = vector.broadcast %cst_9 : f32 to vector<8x64xf32>
    %11 = arith.maximumf %9, %10 : vector<8x64xf32>
    %cst_10 = arith.constant dense<0.000000e+00> : vector<8x64xf32>
    %12 = tpu.matmul %11, %2, %cst_10 {dimension_numbers = #tpu.dot_dimension_numbers<[1], [0], [0], [1], [0, 0, 1, 1], [], []>} : vector<8x64xf32>, vector<64x64xf32>, vector<8x64xf32> -> vector<8x64xf32>
    %13 = vector.broadcast %5 : vector<1x64xf32> to vector<8x64xf32>
    %14 = arith.addf %12, %13 : vector<8x64xf32>
    %cst_11 = arith.constant 0.000000e+00 : f32
    %15 = vector.broadcast %cst_11 : f32 to vector<8x64xf32>
    %16 = arith.maximumf %14, %15 : vector<8x64xf32>
    %cst_12 = arith.constant dense<0.000000e+00> : vector<8x4xf32>
    %17 = tpu.matmul %16, %3, %cst_12 {dimension_numbers = #tpu.dot_dimension_numbers<[1], [0], [0], [1], [0, 0, 1, 1], [], []>} : vector<8x64xf32>, vector<64x4xf32>, vector<8x4xf32> -> vector<8x4xf32>
    %18 = vector.broadcast %6 : vector<1x4xf32> to vector<8x4xf32>
    %19 = arith.addf %17, %18 : vector<8x4xf32>
    %c0_13 = arith.constant 0 : index
    %c0_14 = arith.constant 0 : index
    %20 = vector.load %arg4[%c0_13, %c0_14] : memref<8x4xf32, #tpu.memory_space<vmem>>, vector<8x4xf32>
    tpu.vector_store %arg4[%c0_13, %c0_14], %19 {strides = array<i32>} : memref<8x4xf32, #tpu.memory_space<vmem>>, vector<8x4xf32>,
    return
  }
  func.func @transform_0(%arg0: i32) -> (i32, i32) {
    %c0_i32 = arith.constant 0 : i32
    %c0_i32_0 = arith.constant 0 : i32
    return %arg0, %c0_i32 : i32, i32
  }
  func.func @transform_1(%arg0: i32) -> (i32, i32) {
    %c0_i32 = arith.constant 0 : i32
    %c0_i32_0 = arith.constant 0 : i32
    %c0_i32_1 = arith.constant 0 : i32
    return %c0_i32, %c0_i32_0 : i32, i32
  }
  func.func @transform_2(%arg0: i32) -> (i32, i32) {
    %c0_i32 = arith.constant 0 : i32
    %c0_i32_0 = arith.constant 0 : i32
    %c0_i32_1 = arith.constant 0 : i32
    return %c0_i32, %c0_i32_0 : i32, i32
  }
  func.func @transform_3(%arg0: i32) -> (i32, i32) {
    %c0_i32 = arith.constant 0 : i32
    %c0_i32_0 = arith.constant 0 : i32
    return %arg0, %c0_i32 : i32, i32
  }
}

</mosaic_0001>

<bundles_post_ra>
// kernel: tpu_custom_call.1
= control target key start
LH: loop header
LB: loop body
LE: loop exit
PB: predicated region body
PF: predicated region fallthrough
CT: control target
= control target key end

     0   :  { %8 = vsyncpa [#allocation3], 0  ;;  %s286_s0 = inlined_call_operand.hbm [shape: f32[8,8], index: 0, kind: input, shape index: {}]   ;;  %s287_s1 = inlined_call_operand.hbm [shape: f32[64,384], index: 1, kind: input, shape index: {}]   ;;  %s288_s2 = inlined_call_operand.hbm [shape: f32[8,128], index: 2, kind: input, shape index: {}]   ;;  %s289_s3 = inlined_call_operand.vmem [shape: f32[8,4], index: 3, kind: output, shape index: {}]  }
   0x1   :  { %9 = vsyncpa [#allocation5], 0  ;;  %s25_s14 = sshll.u32 %s287_s1, 4  ;;  %s249_s15 = smov [#allocation4]   ;;  %s26_s14 = int_to_ptr.hbm [resolvable:$true] %s25_s14 }
   0x2   :  { %s27_s16 = sshll.u32 %s249_s15, 4  ;;  %s15_s19 = sshll.u32 %s286_s0, 4  ;;  %s28_s16 = int_to_ptr.vmem [resolvable:$true] %s27_s16  ;;  %s16_s19 = int_to_ptr.hbm [resolvable:$true] %s15_s19 }
   0x3   :  { %s250_s20 = smov 384   ;;  %s251_s21 = smov 24  }
   0x4   :  { %33 = dma.hbm_to_vmem [thread:$0]  %s26_s14, 3072, %s28_s16, [#allocation5], %s250_s20, %s250_s20, %s251_s21  }
   0x5   :  { %s252_s22 = smov [#allocation2]   ;;  %s39_s26 = sshll.u32 %s288_s2, 4  ;;  %s40_s26 = int_to_ptr.hbm [resolvable:$true] %s39_s26 }
   0x6   :  { %s17_s23 = sshll.u32 %s252_s22, 4  ;;  %s253_s1 = smov [#allocation6]   ;;  %s18_s23 = int_to_ptr.vmem [resolvable:$true] %s17_s23 }
   0x7   :  { %20 = dma.hbm_to_vmem [thread:$0]  %s16_s19, 128, %s18_s23, [#allocation3]  }
   0x8   :  { %s41_s27 = sshll.u32 %s253_s1, 4  ;;  %s42_s27 = int_to_ptr.vmem [resolvable:$true] %s41_s27 }
   0x9   :  { %44 = dma.hbm_to_vmem [thread:$0]  %s40_s26, 128, %s42_s27, [#allocation5]  }
   0xa   :  { %245 = dma.done.wait [#allocation3], 128  }
   0xb   :  { %246 = vsyncadd [#allocation3], 4294967168 }
   0xc   :  { %247 = dma.done.wait [#allocation5], 3200  }
   0xd   :  { %248 = vsyncadd [#allocation5], 4294964096  ;;  %vm79_vm0 = vcmask 64512   ;;  %v58_v0 = vld [vmem:[#allocation4] sm:$0xff]  ;;  %v57_v1 = vld [vmem:[#allocation2] sm:$0xff]  ;;  %vm105_vm1 = vcmask 523264  }
   0xe   :  { %v66_v2 = vld [vmem:[#allocation4 + $0xb0] sm:$0xff]  ;;  %98 = vmatpush.msra.mxu0 %v58_v0  ;;  %v65_v3 = vld [vmem:[#allocation4 + $0x98] sm:$0xff]  ;;  %v64_v4 = vld [vmem:[#allocation4 + $0x80] sm:$0xff]  ;;  %vm154_vm2 = vcmask 31744  }
   0xf   :  { %117 = vmatpush.msra.mxu1 %v66_v2  ;;  %162 = vmatmul.msk.f32.vlgmr.msra.gmra.mxu0 %vm79_vm0, %v57_v1  ;;  %v63_v5 = vld [vmem:[#allocation4 + $0x68] sm:$0xff]  ;;  %v62_v6 = vld [vmem:[#allocation4 + $0x50] sm:$0xff]  ;;  %v61_v7 = vld [vmem:[#allocation4 + $0x38] sm:$0xff] }
  0x10   :  { %v60_v8 = vld [vmem:[#allocation4 + $0x20] sm:$0xff]  ;;  %v59_v9 = vld [vmem:[#allocation4 + $0x8] sm:$0xff]  ;;  %v74_v10 = vld [vmem:[#allocation4 + $0xb8] sm:$0xff] }
  0x11   :  { %118 = vmatpush.msra.mxu1 %v65_v3  ;;  %v73_v11 = vld [vmem:[#allocation4 + $0xa0] sm:$0xff]  ;;  %142 = vmatpush.msra.mxu2 %v74_v10  ;;  %v72_v12 = vld [vmem:[#allocation4 + $0x88] sm:$0xff]  ;;  %v71_v13 = vld [vmem:[#allocation4 + $0x70] sm:$0xff] }
  0x12   :  { %v70_v14 = vld [vmem:[#allocation4 + $0x58] sm:$0xff]  ;;  %v170_v15 = vld [vmem:[#allocation6] ss:$0 sm:$0xff]  ;;  %v68_v20 = vld [vmem:[#allocation4 + $0x28] sm:$0xff] }
  0x13   :  { %119 = vmatpush.msra.mxu1 %v64_v4  ;;  %143 = vmatpush.msra.mxu2 %v73_v11  ;;  %v69_v19 = vld [vmem:[#allocation4 + $0x40] sm:$0xff]  ;;  %v67_v21 = vld [vmem:[#allocation4 + $0x10] sm:$0xff] }
  0x14   :  { %v171_v22 = vld [vmem:[#allocation6 + $0x1] ss:$0 sm:$0xff]  ;;  %v172_v26 = vld [vmem:[#allocation6 + $0x2] ss:$0 sm:$0xff] }
  0x15   :  { %120 = vmatpush.msra.mxu1 %v63_v5  ;;  %144 = vmatpush.msra.mxu2 %v72_v12 }
  0x17   :  { %121 = vmatpush.msra.mxu1 %v62_v6  ;;  %145 = vmatpush.msra.mxu2 %v71_v13 }
  0x19   :  { %122 = vmatpush.msra.mxu1 %v61_v7  ;;  %146 = vmatpush.msra.mxu2 %v70_v14 }
  0x1b   :  { %123 = vmatpush.msra.mxu1 %v60_v8  ;;  %147 = vmatpush.msra.mxu2 %v69_v19 }
  0x1d   :  { %124 = vmatpush.msra.mxu1 %v59_v9  ;;  %148 = vmatpush.msra.mxu2 %v68_v20 }
  0x1f   :  { %149 = vmatpush.msra.mxu2 %v67_v21 }
  0x8c   :  { %v100_v16 = vpop.f32.mrf.mxu0 }
  0x8d   :  { %v101_v17 = vadd.f32 %v170_v15, %v100_v16 }
  0x8f   :  { %v103_v18 = vmax.f32 %v101_v17, 0.0 }
  0x91   :  { %163 = vmatmul.msk.f32.vlgmr.msra.gmra.mxu1 %vm105_vm1, %v103_v18 }
 0x10e   :  { %v126_v23 = vpop.f32.mrf.mxu1 }
 0x10f   :  { %v127_v24 = vadd.f32 %v171_v22, %v126_v23 }
 0x111   :  { %v129_v25 = vmax.f32 %v127_v24, 0.0 }
 0x113   :  { %164 = vmatmul.msk.f32.vlgmr.msra.gmra.mxu2 %vm105_vm1, %v129_v25 }
 0x196   :  { %v151_v27 = vpop.f32.mrf.mxu2 }
 0x197   :  { %v152_v28 = vadd.f32 %v172_v26, %v151_v27 }
 0x199   :  { %155 = vst.msk [vmem:[%s289_s3] sm:$0xff] %vm154_vm2, %v152_v28 }
 0x19a   :  { %160 = vsyncpa [#allocation3], 1 }
 0x19b   :  { %161 = vsyncpa [#allocation5], 1 }

</bundles_post_ra>
